<compile_context>
chip_gen: v5e
topology: v5e:2x2
jax: 0.10.0
libtpu: 0.0.40
codegen_flags: <defaults>
</compile_context>

<pallas_src>
import functools

import jax
import jax.numpy as jnp
from jax import lax
from jax.experimental import pallas as pl
from jax.experimental.pallas import tpu as pltpu

EPS = 1e-5


# ----------------------------------------------------------------------------
# Pallas kernel: one batch element per grid step, everything VMEM-resident.
# ----------------------------------------------------------------------------
def _motif_kernel(L, K3, H,
                  x_ref,                       # (1, L, 20)  conv1 im2col slab
                  w1_ref, s1_ref, t1_ref,      # (20, H), (1, H), (1, H)
                  w2_ref, s2_ref, t2_ref,      # (H, 2H), (1, 2H), (1, 2H)
                  w3_ref, s3_ref, t3_ref,      # (K3*2H, H), (1, H), (1, H)
                  w4_ref, b4_ref,              # (H, 2), (1, 2)   (b4 pre-scaled by L3)
                  out_ref):                    # (1, 1, 2)
    f32 = jnp.float32
    L3 = L - K3 + 1

    xs = x_ref[0]                                            # (L, 20)

    # ---- conv1 (im2col) + BN1(eval, bias folded) + ReLU
    h = jnp.dot(xs, w1_ref[...], preferred_element_type=f32)          # (L, H)
    h = jnp.maximum(h * s1_ref[...] + t1_ref[...], 0.0)

    # ---- conv2 (1x1) + BN2 + ReLU
    h = jnp.dot(h, w2_ref[...], preferred_element_type=f32)           # (L, 2H)
    h = jnp.maximum(h * s2_ref[...] + t2_ref[...], 0.0)

    # ---- conv3 (valid, kernel K3) as a single im2col matmul + BN3 + ReLU
    slab = jnp.concatenate([h[k:k + L3, :] for k in range(K3)], axis=-1)  # (L3, K3*2H)
    g = jnp.dot(slab, w3_ref[...], preferred_element_type=f32)        # (L3, H)
    g = jnp.maximum(g * s3_ref[...] + t3_ref[...], 0.0)

    # ---- sum over positions, THEN conv4 (1x1); b4 already scaled by L3
    gsum = jnp.sum(g, axis=0, keepdims=True)                           # (1, H)
    y = jnp.dot(gsum, w4_ref[...], preferred_element_type=f32) + b4_ref[...]
    out_ref[...] = y.reshape(1, 1, 2)


# ----------------------------------------------------------------------------
# Wrapper: parameter folding, conv1 im2col, pallas_call over the batch grid.
# ----------------------------------------------------------------------------
def motif_forward_pallas(x, params, window_size):
    """x: (N, L, 4) float32 (the module's input before its internal transpose)."""
    N, L, _ = x.shape
    K3 = window_size - 4
    L3 = L - K3 + 1
    assert K3 >= 1 and L3 >= 1, "window_size incompatible with sequence length"
    H = params["w1"].shape[-1]

    def fold_bn(gamma, beta, mean, var, bias):
        # BN(conv + bias) == conv * s + (beta - mean*s + bias*s)
        s = gamma / jnp.sqrt(var + EPS)
        t = beta - mean * s + bias * s
        return s[None, :], t[None, :]                        # (1, C)

    s1, t1 = fold_bn(*params["bn1"], params["b1"])
    s2, t2 = fold_bn(*params["bn2"], params["b2"])
    s3, t3 = fold_bn(*params["bn3"], params["b3"])

    # conv1 im2col built once in plain JAX: pad=2, stack the 5 taps on channels.
    xp = jnp.pad(x, ((0, 0), (2, 2), (0, 0)))                           # (N, L+4, 4)
    x_im2col = jnp.concatenate([xp[:, k:k + L, :] for k in range(5)], axis=-1)  # (N, L, 20)

    w1f = params["w1"].reshape(5 * 4, H)                     # (20, H)
    w3f = params["w3"].reshape(K3 * 2 * H, H)                # (K3*2H, H)
    b4s = (L3 * params["b4"])[None, :]                       # conv4 commuted past sum

    args = (x_im2col,
            w1f, s1, t1,
            params["w2"], s2, t2,
            w3f, s3, t3,
            params["w4"], b4s)

    def full_spec(a):
        return pl.BlockSpec(a.shape, lambda i: (0,) * a.ndim)

    in_specs = [pl.BlockSpec((1, L, 5 * 4), lambda i: (i, 0, 0))]
    in_specs += [full_spec(a) for a in args[1:]]

    kernel = functools.partial(_motif_kernel, L, K3, H)
    out = pl.pallas_call(
        kernel,
        grid=(N,),
        out_shape=jax.ShapeDtypeStruct((N, 1, 2), jnp.float32),
        in_specs=in_specs,
        out_specs=pl.BlockSpec((1, 1, 2), lambda i: (i, 0, 0)),
        compiler_params=pltpu.CompilerParams(
            dimension_semantics=("parallel",)),
    )(*args)
    return out.reshape(N, 2)


# ----------------------------------------------------------------------------
# Plain-JAX reference (mirrors torch Conv1d / eval BatchNorm1d / ReLU / sum)
# ----------------------------------------------------------------------------
def motif_forward_ref(x, params, window_size):
    xc = jnp.transpose(x, (0, 2, 1))                # (N, 4, L)  == torch NCW

    def conv1d(z, w_kio, b, pad):
        if w_kio.ndim == 2:                         # 1x1 conv stored as (Cin, Cout)
            w_kio = w_kio[None]                     # -> (1, Cin, Cout)
        w = jnp.transpose(w_kio, (2, 1, 0))         # (K, Cin, Cout) -> (Cout, Cin, K)
        y = lax.conv_general_dilated(
            z, w, window_strides=(1,), padding=[(pad, pad)],
            dimension_numbers=("NCH", "OIH", "NCH"))
        return y + b[None, :, None]

    def bn(z, gamma, beta, mean, var):
        return (z - mean[None, :, None]) / jnp.sqrt(var[None, :, None] + EPS) \
               * gamma[None, :, None] + beta[None, :, None]

    relu = lambda z: jnp.maximum(z, 0.0)

    h = relu(bn(conv1d(xc, params["w1"], params["b1"], 2), *params["bn1"]))
    h = relu(bn(conv1d(h, params["w2"], params["b2"], 0), *params["bn2"]))
    h = relu(bn(conv1d(h, params["w3"], params["b3"], 0), *params["bn3"]))
    h = conv1d(h, params["w4"], params["b4"], 0)    # (N, 2, L3)
    return jnp.sum(h, axis=2)                       # x.sum(2) -> (N, 2)


# ----------------------------------------------------------------------------
# Deterministic synthetic parameters (shapes per MotifModel.__init__)
# ----------------------------------------------------------------------------
def make_params(key, hidden_size, window_size):
    H = hidden_size
    K3 = window_size - 4
    ks = jax.random.split(key, 16)
    nrm = lambda k, shp, s=0.2: s * jax.random.normal(k, shp, jnp.float32)

    def bn_params(k, C):
        a, b, c, d = jax.random.split(k, 4)
        gamma = 1.0 + 0.1 * jax.random.normal(a, (C,), jnp.float32)
        beta = 0.1 * jax.random.normal(b, (C,), jnp.float32)
        mean = 0.1 * jax.random.normal(c, (C,), jnp.float32)
        var = 0.5 + jnp.abs(jax.random.normal(d, (C,), jnp.float32))
        return (gamma, beta, mean, var)

    return {
        # conv weights stored as (K, C_in, C_out); torch stores (C_out, C_in, K)
        "w1": nrm(ks[0], (5, 4, H)), "b1": nrm(ks[1], (H,)),
        "bn1": bn_params(ks[2], H),
        "w2": nrm(ks[3], (H, 2 * H)), "b2": nrm(ks[4], (2 * H,)),
        "bn2": bn_params(ks[5], 2 * H),
        "w3": nrm(ks[6], (K3, 2 * H, H)), "b3": nrm(ks[7], (H,)),
        "bn3": bn_params(ks[8], H),
        "w4": nrm(ks[9], (H, 2)), "b4": nrm(ks[10], (2,)),
    }


if __name__ == "__main__":
    hidden_size = 16
    window_size = 8          # conv3 kernel = window_size - 4 = 4
    N, L = 2, 16             # input (N, L, 4)

    key = jax.random.PRNGKey(0)
    kx, kp = jax.random.split(key)
    x = jax.random.normal(kx, (N, L, 4), jnp.float32)
    params = make_params(kp, hidden_size, window_size)

    out = motif_forward_pallas(x, params, window_size)
    out = jax.block_until_ready(out)

    ref = motif_forward_ref(x, params, window_size)
    assert out.shape == (N, 2)
    assert jnp.allclose(out, ref, atol=1e-4, rtol=1e-4), (out, ref)
    print("KERNEL_OK")
</pallas_src>

<mosaic_0001>
module attributes {stable_mosaic.version = 11 : i64} {
  func.func @_motif_kernel(%arg0: i32, %arg1: memref<1x16x20xf32, #tpu.memory_space<vmem>>, %arg2: memref<20x16xf32, #tpu.memory_space<vmem>>, %arg3: memref<1x16xf32, #tpu.memory_space<vmem>>, %arg4: memref<1x16xf32, #tpu.memory_space<vmem>>, %arg5: memref<16x32xf32, #tpu.memory_space<vmem>>, %arg6: memref<1x32xf32, #tpu.memory_space<vmem>>, %arg7: memref<1x32xf32, #tpu.memory_space<vmem>>, %arg8: memref<128x16xf32, #tpu.memory_space<vmem>>, %arg9: memref<1x16xf32, #tpu.memory_space<vmem>>, %arg10: memref<1x16xf32, #tpu.memory_space<vmem>>, %arg11: memref<16x2xf32, #tpu.memory_space<vmem>>, %arg12: memref<1x2xf32, #tpu.memory_space<vmem>>, %arg13: memref<1x1x2xf32, #tpu.memory_space<vmem>>) attributes {dimension_semantics = [#tpu.dimension_semantics<parallel>], iteration_bounds = array<i64: 2>, scalar_prefetch = 0 : i64, scratch_operands = 0 : i64, tpu.core_type = #tpu.core_type<tc>, window_params = [{transform_indices = @transform_0, window_bounds = array<i64: 1, 16, 20>}, {pipeline_mode = #tpu.pipeline_mode<synchronous>, transform_indices = @transform_1, window_bounds = array<i64: 20, 16>}, {pipeline_mode = #tpu.pipeline_mode<synchronous>, transform_indices = @transform_2, window_bounds = array<i64: 1, 16>}, {pipeline_mode = #tpu.pipeline_mode<synchronous>, transform_indices = @transform_3, window_bounds = array<i64: 1, 16>}, {pipeline_mode = #tpu.pipeline_mode<synchronous>, transform_indices = @transform_4, window_bounds = array<i64: 16, 32>}, {pipeline_mode = #tpu.pipeline_mode<synchronous>, transform_indices = @transform_5, window_bounds = array<i64: 1, 32>}, {pipeline_mode = #tpu.pipeline_mode<synchronous>, transform_indices = @transform_6, window_bounds = array<i64: 1, 32>}, {pipeline_mode = #tpu.pipeline_mode<synchronous>, transform_indices = @transform_7, window_bounds = array<i64: 128, 16>}, {pipeline_mode = #tpu.pipeline_mode<synchronous>, transform_indices = @transform_8, window_bounds = array<i64: 1, 16>}, {pipeline_mode = #tpu.pipeline_mode<synchronous>, transform_indices = @transform_9, window_bounds = array<i64: 1, 16>}, {pipeline_mode = #tpu.pipeline_mode<synchronous>, transform_indices = @transform_10, window_bounds = array<i64: 16, 2>}, {pipeline_mode = #tpu.pipeline_mode<synchronous>, transform_indices = @transform_11, window_bounds = array<i64: 1, 2>}, {transform_indices = @transform_12, window_bounds = array<i64: 1, 1, 2>}]} {
    %c0 = arith.constant 0 : index
    %c0_0 = arith.constant 0 : index
    %c0_1 = arith.constant 0 : index
    %0 = vector.load %arg1[%c0, %c0_0, %c0_1] : memref<1x16x20xf32, #tpu.memory_space<vmem>>, vector<1x16x20xf32>
    %1 = vector.shape_cast %0 : vector<1x16x20xf32> to vector<16x20xf32>
    %c0_2 = arith.constant 0 : index
    %c0_3 = arith.constant 0 : index
    %2 = vector.load %arg2[%c0_2, %c0_3] : memref<20x16xf32, #tpu.memory_space<vmem>>, vector<20x16xf32>
    %cst = arith.constant dense<0.000000e+00> : vector<16x16xf32>
    %3 = tpu.matmul %1, %2, %cst {dimension_numbers = #tpu.dot_dimension_numbers<[1], [0], [0], [1], [0, 0, 1, 1], [], []>} : vector<16x20xf32>, vector<20x16xf32>, vector<16x16xf32> -> vector<16x16xf32>
    %c0_4 = arith.constant 0 : index
    %c0_5 = arith.constant 0 : index
    %4 = vector.load %arg3[%c0_4, %c0_5] : memref<1x16xf32, #tpu.memory_space<vmem>>, vector<1x16xf32>
    %5 = vector.broadcast %4 : vector<1x16xf32> to vector<16x16xf32>
    %6 = arith.mulf %3, %5 : vector<16x16xf32>
    %c0_6 = arith.constant 0 : index
    %c0_7 = arith.constant 0 : index
    %7 = vector.load %arg4[%c0_6, %c0_7] : memref<1x16xf32, #tpu.memory_space<vmem>>, vector<1x16xf32>
    %8 = vector.broadcast %7 : vector<1x16xf32> to vector<16x16xf32>
    %9 = arith.addf %6, %8 : vector<16x16xf32>
    %cst_8 = arith.constant 0.000000e+00 : f32
    %10 = vector.broadcast %cst_8 : f32 to vector<16x16xf32>
    %11 = arith.maximumf %9, %10 : vector<16x16xf32>
    %c0_9 = arith.constant 0 : index
    %c0_10 = arith.constant 0 : index
    %12 = vector.load %arg5[%c0_9, %c0_10] : memref<16x32xf32, #tpu.memory_space<vmem>>, vector<16x32xf32>
    %cst_11 = arith.constant dense<0.000000e+00> : vector<16x32xf32>
    %13 = tpu.matmul %11, %12, %cst_11 {dimension_numbers = #tpu.dot_dimension_numbers<[1], [0], [0], [1], [0, 0, 1, 1], [], []>} : vector<16x16xf32>, vector<16x32xf32>, vector<16x32xf32> -> vector<16x32xf32>
    %c0_12 = arith.constant 0 : index
    %c0_13 = arith.constant 0 : index
    %14 = vector.load %arg6[%c0_12, %c0_13] : memref<1x32xf32, #tpu.memory_space<vmem>>, vector<1x32xf32>
    %15 = vector.broadcast %14 : vector<1x32xf32> to vector<16x32xf32>
    %16 = arith.mulf %13, %15 : vector<16x32xf32>
    %c0_14 = arith.constant 0 : index
    %c0_15 = arith.constant 0 : index
    %17 = vector.load %arg7[%c0_14, %c0_15] : memref<1x32xf32, #tpu.memory_space<vmem>>, vector<1x32xf32>
    %18 = vector.broadcast %17 : vector<1x32xf32> to vector<16x32xf32>
    %19 = arith.addf %16, %18 : vector<16x32xf32>
    %cst_16 = arith.constant 0.000000e+00 : f32
    %20 = vector.broadcast %cst_16 : f32 to vector<16x32xf32>
    %21 = arith.maximumf %19, %20 : vector<16x32xf32>
    %22 = vector.extract_strided_slice %21 {offsets = [0, 0], sizes = [13, 32], strides = [1, 1]} : vector<16x32xf32> to vector<13x32xf32>
    %23 = vector.extract_strided_slice %21 {offsets = [1, 0], sizes = [13, 32], strides = [1, 1]} : vector<16x32xf32> to vector<13x32xf32>
    %24 = vector.extract_strided_slice %21 {offsets = [2, 0], sizes = [13, 32], strides = [1, 1]} : vector<16x32xf32> to vector<13x32xf32>
    %25 = vector.extract_strided_slice %21 {offsets = [3, 0], sizes = [13, 32], strides = [1, 1]} : vector<16x32xf32> to vector<13x32xf32>
    %26 = tpu.concatenate %22, %23, %24, %25 in 1 : vector<13x32xf32>, vector<13x32xf32>, vector<13x32xf32>, vector<13x32xf32> -> vector<13x128xf32>
    %c0_17 = arith.constant 0 : index
    %c0_18 = arith.constant 0 : index
    %27 = vector.load %arg8[%c0_17, %c0_18] : memref<128x16xf32, #tpu.memory_space<vmem>>, vector<128x16xf32>
    %cst_19 = arith.constant dense<0.000000e+00> : vector<13x16xf32>
    %28 = tpu.matmul %26, %27, %cst_19 {dimension_numbers = #tpu.dot_dimension_numbers<[1], [0], [0], [1], [0, 0, 1, 1], [], []>} : vector<13x128xf32>, vector<128x16xf32>, vector<13x16xf32> -> vector<13x16xf32>
    %c0_20 = arith.constant 0 : index
    %c0_21 = arith.constant 0 : index
    %29 = vector.load %arg9[%c0_20, %c0_21] : memref<1x16xf32, #tpu.memory_space<vmem>>, vector<1x16xf32>
    %30 = vector.broadcast %29 : vector<1x16xf32> to vector<13x16xf32>
    %31 = arith.mulf %28, %30 : vector<13x16xf32>
    %c0_22 = arith.constant 0 : index
    %c0_23 = arith.constant 0 : index
    %32 = vector.load %arg10[%c0_22, %c0_23] : memref<1x16xf32, #tpu.memory_space<vmem>>, vector<1x16xf32>
    %33 = vector.broadcast %32 : vector<1x16xf32> to vector<13x16xf32>
    %34 = arith.addf %31, %33 : vector<13x16xf32>
    %cst_24 = arith.constant 0.000000e+00 : f32
    %35 = vector.broadcast %cst_24 : f32 to vector<13x16xf32>
    %36 = arith.maximumf %34, %35 : vector<13x16xf32>
    %cst_25 = arith.constant dense<0.000000e+00> : vector<16xf32>
    %37 = vector.multi_reduction <add>, %36, %cst_25 [0] : vector<13x16xf32> to vector<16xf32>
    %38 = vector.shape_cast %37 : vector<16xf32> to vector<1x16xf32>
    %c0_26 = arith.constant 0 : index
    %c0_27 = arith.constant 0 : index
    %39 = vector.load %arg11[%c0_26, %c0_27] : memref<16x2xf32, #tpu.memory_space<vmem>>, vector<16x2xf32>
    %cst_28 = arith.constant dense<0.000000e+00> : vector<1x2xf32>
    %40 = tpu.matmul %38, %39, %cst_28 {dimension_numbers = #tpu.dot_dimension_numbers<[1], [0], [0], [1], [0, 0, 1, 1], [], []>} : vector<1x16xf32>, vector<16x2xf32>, vector<1x2xf32> -> vector<1x2xf32>
    %c0_29 = arith.constant 0 : index
    %c0_30 = arith.constant 0 : index
    %41 = vector.load %arg12[%c0_29, %c0_30] : memref<1x2xf32, #tpu.memory_space<vmem>>, vector<1x2xf32>
    %42 = arith.addf %40, %41 : vector<1x2xf32>
    %43 = vector.shape_cast %42 : vector<1x2xf32> to vector<1x1x2xf32>
    %c0_31 = arith.constant 0 : index
    %c0_32 = arith.constant 0 : index
    %c0_33 = arith.constant 0 : index
    %44 = vector.load %arg13[%c0_31, %c0_32, %c0_33] : memref<1x1x2xf32, #tpu.memory_space<vmem>>, vector<1x1x2xf32>
    tpu.vector_store %arg13[%c0_31, %c0_32, %c0_33], %43 {strides = array<i32>} : memref<1x1x2xf32, #tpu.memory_space<vmem>>, vector<1x1x2xf32>,
    return
  }
  func.func @transform_0(%arg0: i32) -> (i32, i32, i32) {
    %c0_i32 = arith.constant 0 : i32
    %c0_i32_0 = arith.constant 0 : i32
    %c0_i32_1 = arith.constant 0 : i32
    return %arg0, %c0_i32, %c0_i32_0 : i32, i32, i32
  }
  func.func @transform_1(%arg0: i32) -> (i32, i32) {
    %c0_i32 = arith.constant 0 : i32
    %c0_i32_0 = arith.constant 0 : i32
    %c0_i32_1 = arith.constant 0 : i32
    return %c0_i32, %c0_i32_0 : i32, i32
  }
  func.func @transform_2(%arg0: i32) -> (i32, i32) {
    %c0_i32 = arith.constant 0 : i32
    %c0_i32_0 = arith.constant 0 : i32
    %c0_i32_1 = arith.constant 0 : i32
    return %c0_i32, %c0_i32_0 : i32, i32
  }
  func.func @transform_3(%arg0: i32) -> (i32, i32) {
    %c0_i32 = arith.constant 0 : i32
    %c0_i32_0 = arith.constant 0 : i32
    %c0_i32_1 = arith.constant 0 : i32
    return %c0_i32, %c0_i32_0 : i32, i32
  }
  func.func @transform_4(%arg0: i32) -> (i32, i32) {
    %c0_i32 = arith.constant 0 : i32
    %c0_i32_0 = arith.constant 0 : i32
    %c0_i32_1 = arith.constant 0 : i32
    return %c0_i32, %c0_i32_0 : i32, i32
  }
  func.func @transform_5(%arg0: i32) -> (i32, i32) {
    %c0_i32 = arith.constant 0 : i32
    %c0_i32_0 = arith.constant 0 : i32
    %c0_i32_1 = arith.constant 0 : i32
    return %c0_i32, %c0_i32_0 : i32, i32
  }
  func.func @transform_6(%arg0: i32) -> (i32, i32) {
    %c0_i32 = arith.constant 0 : i32
    %c0_i32_0 = arith.constant 0 : i32
    %c0_i32_1 = arith.constant 0 : i32
    return %c0_i32, %c0_i32_0 : i32, i32
  }
  func.func @transform_7(%arg0: i32) -> (i32, i32) {
    %c0_i32 = arith.constant 0 : i32
    %c0_i32_0 = arith.constant 0 : i32
    %c0_i32_1 = arith.constant 0 : i32
    return %c0_i32, %c0_i32_0 : i32, i32
  }
  func.func @transform_8(%arg0: i32) -> (i32, i32) {
    %c0_i32 = arith.constant 0 : i32
    %c0_i32_0 = arith.constant 0 : i32
    %c0_i32_1 = arith.constant 0 : i32
    return %c0_i32, %c0_i32_0 : i32, i32
  }
  func.func @transform_9(%arg0: i32) -> (i32, i32) {
    %c0_i32 = arith.constant 0 : i32
    %c0_i32_0 = arith.constant 0 : i32
    %c0_i32_1 = arith.constant 0 : i32
    return %c0_i32, %c0_i32_0 : i32, i32
  }
  func.func @transform_10(%arg0: i32) -> (i32, i32) {
    %c0_i32 = arith.constant 0 : i32
    %c0_i32_0 = arith.constant 0 : i32
    %c0_i32_1 = arith.constant 0 : i32
    return %c0_i32, %c0_i32_0 : i32, i32
  }
  func.func @transform_11(%arg0: i32) -> (i32, i32) {
    %c0_i32 = arith.constant 0 : i32
    %c0_i32_0 = arith.constant 0 : i32
    %c0_i32_1 = arith.constant 0 : i32
    return %c0_i32, %c0_i32_0 : i32, i32
  }
  func.func @transform_12(%arg0: i32) -> (i32, i32, i32) {
    %c0_i32 = arith.constant 0 : i32
    %c0_i32_0 = arith.constant 0 : i32
    %c0_i32_1 = arith.constant 0 : i32
    return %arg0, %c0_i32, %c0_i32_0 : i32, i32, i32
  }
}

</mosaic_0001>

<bundles_post_ra>
// kernel: tpu_custom_call.1
= control target key start
LH: loop header
LB: loop body
LE: loop exit
PB: predicated region body
PF: predicated region fallthrough
CT: control target
= control target key end

     0   :  { %s1096_s0 = inlined_call_operand.vmem [shape: f32[2,16,20], index: 0, kind: input, shape index: {}]   ;;  %s1097_s1 = inlined_call_operand.vmem [shape: f32[20,16], index: 1, kind: input, shape index: {}]   ;;  %s1098_s2 = inlined_call_operand.vmem [shape: f32[1,16], index: 2, kind: input, shape index: {}]   ;;  %s1099_s3 = inlined_call_operand.vmem [shape: f32[1,16], index: 3, kind: input, shape index: {}]   ;;  %s1100_s4 = inlined_call_operand.vmem [shape: f32[16,32], index: 4, kind: input, shape index: {}]   ;;  %s1101_s5 = inlined_call_operand.vmem [shape: f32[1,32], index: 5, kind: input, shape index: {}]   ;;  %s1102_s6 = inlined_call_operand.vmem [shape: f32[1,32], index: 6, kind: input, shape index: {}]   ;;  %s1103_s7 = inlined_call_operand.vmem [shape: f32[128,16], index: 7, kind: input, shape index: {}]   ;;  %s1104_s8 = inlined_call_operand.vmem [shape: f32[1,16], index: 8, kind: input, shape index: {}]   ;;  %s1105_s9 = inlined_call_operand.vmem [shape: f32[1,16], index: 9, kind: input, shape index: {}]   ;;  %s1106_s10 = inlined_call_operand.vmem [shape: f32[16,2], index: 10, kind: input, shape index: {}]   ;;  %s1107_s11 = inlined_call_operand.vmem [shape: f32[1,2], index: 11, kind: input, shape index: {}]   ;;  %s1108_s12 = inlined_call_operand.hbm [shape: f32[2,1,2], index: 12, kind: output, shape index: {}]  }
   0x1   :  { %1109 = sst [smem:[#allocation5_spill]] %s1096_s0 }
   0x2   :  { %1110 = sst [smem:[#allocation6_spill]] %s1097_s1 }
   0x3   :  { %1111 = sst [smem:[#allocation7_spill]] %s1098_s2 }
   0x4   :  { %17 = vsyncpa [#allocation3], 0 }
   0x5   :  { %19 = vsyncpa [#allocation3 + $0x1], 0  ;;  %s905_s21 = smov 0   ;;  %s907_s22 = smov 0  }
   0x6   :  { %s909_s23 = smov 0   ;;  %s911_s24 = smov 0  }
   0x7 LB: > { %s926_s25 = sadd.s32 4294967295, %s835_s24   ;;  %s710_s26 = sadd.s32 4294967294, %s835_s24   ;;  %s835_s24 = sphi %s911_s24, %s1120_s24   ;;  %s831_s23 = sphi %s909_s23, %s1119_s23   ;;  %s827_s22 = sphi %s907_s22, %s1118_s22   ;;  %s823_s21 = sphi %s905_s21, %s1117_s21  }
   0x8   : > { %s930_s27 = sadd.s32 1, %s835_s24   ;;  %s289_s28 = sadd.s32 1, %s831_s23 }
   0x9   : > { %s286_s29 = ssub.s32 %s835_s24, %s930_s27  ;;  %p299_p0 = scmp.ne.s32.totalorder %s831_s23, %s827_s22 }
   0xa   : > { %p287_p1 = scmp.eq.s32.totalorder %s286_s29, 0  ;;  %p300_p2 = scmp.eq.s32.totalorder %s926_s25, 1 }
   0xb   : > { %p305_p3 = scmp.ne.s32.totalorder %s827_s22, %s823_s21  ;;  %p306_p4 = scmp.eq.s32.totalorder %s710_s26, 1 }
   0xc   : > { %s941_s30 = scalar_select %p287_p1, %s831_s23, %s289_s28  }
   0xd   : > { %p943_p5 = por %p300_p2, %p299_p0  ;;  %p947_p6 = por %p306_p4, %p305_p3 }
   0xe   : > { %p713_p7 = scmp.ge.s32.totalorder %s835_s24, 1  ;;  %p365_p8 = scmp.lt.s32.totalorder %s835_s24, 3 }
  0x10   : > { %p366_p9 = pnand %p713_p7, %p365_p8 }
  0x11   : > { %s1114_s1 = sld [smem:[#allocation6_spill]] (!%p366_p9)  ;;  %p406_p10 = scmp.lt.s32.totalorder (!%p366_p9), %s926_s25, 1 }
  0x12   : > { %369 = sbr.rel (%p366_p9) target bundleno = 727 (0x2d7), region = 68  ;;  %s1115_s0 = sld [smem:[#allocation5_spill]] (!%p366_p9) }
  0x13   : > { %s1116_s2 = sld [smem:[#allocation7_spill]] (!%p366_p9)  ;;  %s837_s18 = smov (!%p366_p9), 64  }
  0x14   : > { %s838_s19 = smov (!%p366_p9), 96   ;;  %s839_s20 = smov (!%p366_p9), 32  }
  0x15   : > { %s404_s17 = sand.u32 (!%p366_p9), 1, %s827_s22  }
  0x17   : > { %v415_v0 = vld [vmem:[%s1114_s1 + $0x10] sm:$0xf]  ;;  %vm423_vm0 = vcmask 1043456   ;;  %v414_v1 = vld [vmem:[%s1114_s1 + $0x8] sm:$0xff]  ;;  %v413_v2 = vld [vmem:[%s1114_s1] sm:$0xff]  ;;  %s407_s26 = scalar_select %p406_p10, %s926_s25, 1 }
  0x18   : > { %716 = vmatpush.msk.msra.mxu0 %vm423_vm0, %v415_v0  ;;  %vm416_vm1 = vcmask 162816   ;;  %v465_v5 = vld [vmem:[%s1100_s4 + $0x8] sm:$0xff]  ;;  %v464_v6 = vld [vmem:[%s1100_s4] sm:$0xff]  ;;  %vm466_vm2 = vcmask 130048   ;;  %vm532_vm3 = vcmask 1044480   ;;  %vm512_vm4 = vcmask 1046528  }
  0x19   : > { %s724_s28 = sshll.u32 %s407_s26, 4  ;;  %487 = vmatpush.msra.mxu1 %v465_v5  ;;  %v767_v7 = vld [vmem:[%s1116_s2] ss:$0 sm:$0xff]  ;;  %vm522_vm5 = vcmask 1045504   ;;  %v566_v36 = vld [vmem:[%s1103_s7 + $0x78] sm:$0xff]  ;;  %v565_v37 = vld [vmem:[%s1103_s7 + $0x70] sm:$0xff] }
  0x1a   : > { %441 = vmatpush.msra.mxu0 %v414_v1  ;;  %s410_s16 = scalar_lea.vmem %s1115_s0, %s724_s28  ;;  %v768_v8 = vld [vmem:[%s1099_s3] ss:$0 sm:$0xff]  ;;  %567 = vmatpush.msra.mxu2 %v566_v36  ;;  %v564_v38 = vld [vmem:[%s1103_s7 + $0x68] sm:$0xff]  ;;  %v562_v40 = vld [vmem:[%s1103_s7 + $0x58] sm:$0xff]  ;;  %vm542_vm6 = vcmask 261120   ;;  %vm545_vm7 = vcmask 523264  }
  0x1b   : > { %v411_v3 = vld [vmem:[%s410_s16] sm:$0xff]  ;;  %v412_v4 = vld [vmem:[%s410_s16 + $0x8] sm:$0xff]  ;;  %488 = vmatpush.msra.mxu1 %v464_v6  ;;  %v561_v41 = vld [vmem:[%s1103_s7 + $0x50] sm:$0xff]  ;;  %vm548_vm8 = vcmask 785408   ;;  %vm605_vm9 = vcmask 126976   ;;  %s405_s28 = scalar_lea.vmem [#allocation2], %s404_s17 }
  0x1c   : > { %442 = vmatpush.msra.mxu0 %v413_v2  ;;  %v769_v17 = vld [vmem:[%s1101_s5] ss:$0 sm:$0xff]  ;;  %568 = vmatpush.msra.mxu2 %v565_v37  ;;  %v560_v42 = vld [vmem:[%s1103_s7 + $0x48] sm:$0xff]  ;;  %v558_v44 = vld [vmem:[%s1103_s7 + $0x38] sm:$0xff]  ;;  %s653_s15 = sshll.u32 %s405_s28, 4  ;;  %vm640_vm10 = vcmask 8192   ;;  %s654_s15 = int_to_ptr.vmem [resolvable:$true] %s653_s15 }
  0x1d   : > { %717 = vmatmul.msk.f32.vlgmr.msra.gmra.mxu0 %vm416_vm1, %v411_v3  ;;  %v770_v20 = vld [vmem:[%s1102_s6] ss:$0 sm:$0xff]  ;;  %v557_v45 = vld [vmem:[%s1103_s7 + $0x30] sm:$0xff]  ;;  %v556_v46 = vld [vmem:[%s1103_s7 + $0x28] sm:$0xff]  ;;  %s643_s0 = scalar_lea.sflag [#allocation3], %s404_s17 }
  0x1e   : > { %v563_v39 = vld [vmem:[%s1103_s7 + $0x60] sm:$0xff]  ;;  %569 = vmatpush.msra.mxu2 %v564_v38  ;;  %v554_v48 = vld [vmem:[%s1103_s7 + $0x18] sm:$0xff]  ;;  %v553_v49 = vld [vmem:[%s1103_s7 + $0x10] sm:$0xff] }
  0x1f   : > { %v559_v43 = vld [vmem:[%s1103_s7 + $0x40] sm:$0xff]  ;;  %v552_v50 = vld [vmem:[%s1103_s7 + $0x8] sm:$0xff] }
  0x20   : > { %570 = vmatpush.msra.mxu2 %v563_v39  ;;  %v555_v47 = vld [vmem:[%s1103_s7 + $0x20] sm:$0xff]  ;;  %v615_v0 = vld [vmem:[%s1106_s10 + $0x8] sm:$0xff] }
  0x21   : > { %v551_v51 = vld [vmem:[%s1103_s7] sm:$0xff]  ;;  %634 = vmatpush.msra.mxu3 %v615_v0 }
  0x22   : > { %571 = vmatpush.msra.mxu2 %v562_v40  ;;  %v614_v1 = vld [vmem:[%s1106_s10] sm:$0xff] }
  0x23   : > { %635 = vmatpush.msra.mxu3 %v614_v1  ;;  %v771_v2 = vld [vmem:[%s1104_s8] ss:$0 sm:$0xff] }
  0x24   : > { %572 = vmatpush.msra.mxu2 %v561_v41  ;;  %v772_v5 = vld [vmem:[%s1105_s9] ss:$0 sm:$0xff] }
  0x25   : > { %718 = vmatmul.msk.f32.gmra.mxu0 %vm416_vm1, %v412_v4 }
  0x26   : > { %573 = vmatpush.msra.mxu2 %v560_v42 }
  0x28   : > { %574 = vmatpush.msra.mxu2 %v559_v43 }
  0x2a   : > { %575 = vmatpush.msra.mxu2 %v558_v44 }
  0x2c   : > { %576 = vmatpush.msra.mxu2 %v557_v45 }
  0x2e   : > { %577 = vmatpush.msra.mxu2 %v556_v46 }
  0x30   : > { %578 = vmatpush.msra.mxu2 %v555_v47 }
  0x32   : > { %579 = vmatpush.msra.mxu2 %v554_v48 }
  0x34   : > { %580 = vmatpush.msra.mxu2 %v553_v49 }
  0x36   : > { %581 = vmatpush.msra.mxu2 %v552_v50 }
  0x38   : > { %582 = vmatpush.msra.mxu2 %v551_v51 }
  0x9a   : > { %v444_v9 = vpop.f32.mrf.mxu0 }
  0x9b   : > { %v454_v10 = vmul.f32 %v767_v7, %v444_v9 }
  0x9d   : > { %v460_v11 = vadd.f32 %v768_v8, %v454_v10 }
  0x9f   : > { %v462_v12 = vmax.f32 %v460_v11, 0.0 }
  0xa1   : > { %719 = vmatmul.msk.f32.vlgmr.msra.gmra.mxu1 %vm466_vm2, %v462_v12 }
  0xa2   : > { %v447_v13 = vpop.f32.mrf.mxu0 }
  0xa3   : > { %v455_v14 = vmul.f32 %v767_v7, %v447_v13 }
  0xa5   : > { %v461_v15 = vadd.f32 %v768_v8, %v455_v14 }
  0xa7   : > { %v463_v16 = vmax.f32 %v461_v15, 0.0 }
  0xa9   : > { %720 = vmatmul.msk.f32.gmra.mxu1 %vm466_vm2, %v463_v16 }
 0x11e   : > { %v490_v18 = vpop.f32.mrf.mxu1 }
 0x11f   : > { %v500_v19 = vmul.f32 %v769_v17, %v490_v18 }
 0x121   : > { %v506_v21 = vadd.f32 %v770_v20, %v500_v19 }
 0x123   : > { %v987_v24 = vmax.f32 %v506_v21, 0.0  ;;  %v616_v21 = vld [vmem:[%s1107_s11] sm:$0x1] }
 0x125   : > { %v533_v27 = vrot.slane %v987_v24, 3  ;;  %v513_v30 = vrot.slane %v987_v24, 1  ;;  %v523_v34 = vrot.slane %v987_v24, 2 }
 0x126   : > { %v493_v22 = vpop.f32.mrf.mxu1 }
 0x127   : > { %v501_v23 = vmul.f32 %v769_v17, %v493_v22 }
 0x129   : > { %v507_v25 = vadd.f32 %v770_v20, %v501_v23 }
 0x12b   : > { %v989_v26 = vmax.f32 %v507_v25, 0.0 }
 0x12d   : > { %v524_v28 = vrot.slane %v989_v26, 2  ;;  %v534_v29 = vrot.slane %v989_v26, 3  ;;  %v514_v31 = vrot.slane %v989_v26, 1 }
 0x12f   : > { %528 = vrot.lane.b32.xlu2 %v524_v28, %s837_s18  ;;  %v535_v32 = vsel %vm532_vm3, %v533_v27, %v534_v29  ;;  %v515_v33 = vsel %vm512_vm4, %v513_v30, %v514_v31  ;;  %v525_v35 = vsel %vm522_vm5, %v523_v34, %v524_v28 }
 0x130   : > { %536 = vrot.lane.b32.xlu1 %v535_v32, %s838_s19  ;;  %516 = vrot.lane.b32.xlu0 %v515_v33, %s839_s20 }
 0x137   : > { %538 = vrot.lane.b32.xlu2 %v534_v29, %s838_s19  ;;  %s793_s19 = scalar_lea.hbm %s1108_s12, 2 }
 0x138   : > { %518 = vrot.lane.b32.xlu1 %v514_v31, %s839_s20  ;;  %526 = vrot.lane.b32.xlu0 %v525_v35, %s837_s18  ;;  %s651_s20 = scalar_lea.hbm %s1108_s12, %s926_s25 }
 0x139   : > { %s655_s1 = sshll.u32 %s651_s20, 4  ;;  %s656_s1 = int_to_ptr.hbm [resolvable:$true] %s655_s1 }
 0x13a   : > { %s787_s16 = sshra.s32 %s656_s1, 4  ;;  %s788_s16 = int_to_ptr.hbm [resolvable:$true] %s787_s16 }
 0x13b   : > { %s789_s2 = scalar_lea.hbm %s788_s16, 1  ;;  %p794_p0 = scmp.lt.s32.totalorder %s788_s16, %s1108_s12 }
 0x13c   : > { %p790_p11 = scmp.ne.s32.totalorder %s788_s16, %s789_s2  ;;  %p795_p1 = scmp.lt.s32.totalorder %s793_s19, %s789_s2 }
 0x13e   : > { %p791_p12 = pnand %p790_p11, %p943_p5  ;;  %p796_p2 = por %p795_p1, %p794_p0 }
 0x140   : > { %p792_p13 = pneg %p791_p12 }
 0x142   : > { %p797_p3 = pnand %p796_p2, %p792_p13 }
 0x189   : > { %v529_v54 = vpop.permute.xlu2 %528 }
 0x191   : > { %v539_v62 = vpop.permute.xlu2 %538 }
 0x1a2   : > { %v537_v52 = vpop.permute.xlu1 %536  ;;  %v517_v53 = vpop.permute.xlu0 %516 }
 0x1a3   : > { %v543_v55 = vsel %vm542_vm6, %v987_v24, %v517_v53 }
 0x1aa   : > { %v527_v56 = vpop.permute.xlu0 %526  ;;  %v519_v57 = vpop.permute.xlu1 %518 }
 0x1ab   : > { %v546_v58 = vsel %vm545_vm7, %v543_v55, %v527_v56  ;;  %v544_v60 = vsel %vm542_vm6, %v989_v26, %v519_v57 }
 0x1ac   : > { %v549_v59 = vsel %vm548_vm8, %v546_v58, %v537_v52  ;;  %v547_v61 = vsel %vm545_vm7, %v544_v60, %v529_v54 }
 0x1ad   : > { %583 = vmatmul.f32.vlgmr.msra.gmra.mxu2 %v549_v59  ;;  %v550_v63 = vsel %vm548_vm8, %v547_v61, %v539_v62 }
 0x1b5   : > { %586 = vmatmul.f32.gmra.mxu2 %v550_v63 }
 0x230   : > { %v584_v3 = vpop.f32.mrf.mxu2 }
 0x231   : > { %v594_v4 = vmul.f32 %v771_v2, %v584_v3 }
 0x233   : > { %v600_v6 = vadd.f32 %v772_v5, %v594_v4 }
 0x235   : > { %v602_v9 = vmax.f32 %v600_v6, 0.0 }
 0x237   : > { %v604_v12 = vsel %vm466_vm2, %v602_v9, 0.0 }
 0x238   : > { %v587_v7 = vpop.f32.mrf.mxu2 }
 0x239   : > { %v595_v8 = vmul.f32 %v771_v2, %v587_v7 }
 0x23b   : > { %v601_v10 = vadd.f32 %v772_v5, %v595_v8 }
 0x23d   : > { %v603_v11 = vmax.f32 %v601_v10, 0.0 }
 0x23f   : > { %v606_v13 = vsel %vm605_vm9, %v603_v11, 0.0 }
 0x240   : > { %v607_v14 = vadd.f32 %v606_v13, %v604_v12 }
 0x242   : > { %v608_v15 = vrot.slane %v607_v14, 4 }
 0x244   : > { %v609_v16 = vadd.f32 %v608_v15, %v607_v14 }
 0x246   : > { %v610_v17 = vrot.slane %v609_v16, 2 }
 0x248   : > { %v611_v18 = vadd.f32 %v610_v17, %v609_v16 }
 0x24a   : > { %v612_v19 = vrot.slane %v611_v18, 1 }
 0x24c   : > { %v613_v20 = vadd.f32 %v612_v19, %v611_v18 }
 0x24e   : > { %721 = vmatmul.msk.f32.vlgmr.msra.gmra.mxu3 %vm466_vm2, %v613_v20 }
 0x2d1   : > { %v637_v22 = vpop.f32.mrf.mxu3 }
 0x2d2   : > { %v638_v23 = vadd.f32 %v637_v22, %v616_v21 }
 0x2d4   : > { %641 = vst.msk [vmem:[%s405_s28] sm:$0x1] %vm640_vm10, %v638_v23 }
 0x2d5   : > { %800 = shalt.err (!%p797_p3)
}
 0x2d6   : > { %725 = dma.vmem_to_hbm [thread:$0]  (%p943_p5), %s654_s15, 16, %s656_s1, %s643_s0  }
 0x2d7 PF: > { %p731_p4 = scmp.ge.s32.totalorder %s835_s24, 2  ;;  %s667_s17 = sand.u32 1, %s823_s21  }
 0x2d8   : > { %s668_s29 = scalar_lea.sflag [#allocation3], %s667_s17 }
 0x2d9   : > { %p728_p7 = pnand %p731_p4, %p947_p6 }
 0x2db   : > { %p729_p8 = pneg %p728_p7 }
 0x2dd   : > { %818 = dma.done.wait (%p729_p8), %s668_s29, 16  }
 0x2de   : > { %820 = vsyncadd (%p729_p8), %s668_s29, 4294967280  ;;  %p22_p9 = scmp.ge.s32.totalorder %s930_s27, 4   ;;  %s1117_s21 = smov %s827_s22 }
 0x2df   : > { %s1118_s22 = smov %s831_s23  ;;  %s1119_s23 = smov %s941_s30 }
 0x2e0   : > { %s1120_s24 = smov %s930_s27  ;;  %24 = sbr.rel (!%p22_p9) target bundleno = 7 (0x7), region = 103 }
 0x2e5   :  { %673 = vsyncpa [#allocation3], 1 }
 0x2e6   :  { %675 = vsyncpa [#allocation3 + $0x1], 1 }

</bundles_post_ra>
